<compile_context>
chip_gen: v7x
topology: tpu7x:2x2x1
jax: 0.10.0
libtpu: 0.0.40
codegen_flags: <defaults>
</compile_context>

<pallas_src>
import functools

import jax
import jax.numpy as jnp
from jax.experimental import pallas as pl
from jax.experimental.pallas import tpu as pltpu

IN_FEATURES = 38
OUT_FEATURES = 9
DEFAULT_BLOCK_B = 2048        # sweep 2048-4096; per-tile VMEM is tiny either way
SMALL_BATCH_XLA_THRESHOLD = 1024


def _round_up(n, m):
    return ((n + m - 1) // m) * m


def _linear_kernel(x_ref, w_ref, b_ref, o_ref):
    # x: (TM, 38), w: (38, 9) resident, b: (1, 9) f32 resident, o: (TM, 9) f32
    acc = jnp.dot(x_ref[...], w_ref[...], preferred_element_type=jnp.float32)  # MXU
    o_ref[...] = (acc + b_ref[...]).astype(o_ref.dtype)


def prepare_params(weight, bias):
    """One-time parameter prep (do NOT call per forward).

    weight: (9, 38) PyTorch nn.Linear layout; bias: (9,).
    Returns w_t: (38, 9) f32, b_row: (1, 9) f32.
    """
    w_t = weight.astype(jnp.float32).T                       # (38, 9)
    b_row = bias.astype(jnp.float32).reshape(1, OUT_FEATURES)
    return w_t, b_row


@functools.partial(jax.jit, static_argnames=("block_b", "force_pallas"))
def symptom_classifier_forward(x, w_t, b_row, *, block_b=DEFAULT_BLOCK_B,
                               force_pallas=False):
    """x: (B, 38). w_t/b_row from prepare_params(). Returns (B, 9) f32."""
    B = x.shape[0]

    # Tiny batches: one fused XLA op beats pallas_call dispatch + pipeline setup.
    if (not force_pallas) and B < SMALL_BATCH_XLA_THRESHOLD:
        return (x.astype(jnp.float32) @ w_t + b_row).astype(jnp.float32)

    # Keep x's dtype (no extra HBM-round-trip cast). W is resident & tiny (19 KiB),
    # so matching it to x.dtype is free; bias stays f32 for the f32 accumulate.
    w = w_t.astype(x.dtype)

    # Batch-tile selection.
    if B <= block_b:
        if B >= 16:
            # >= 2 grid steps so the "parallel" axis shards across both v7x TCs.
            tm = _round_up(pl.cdiv(B, 2), 8)
        else:
            tm = B              # full-extent block — always legal
    else:
        tm = block_b            # multiple of 8; ragged last block masked by Pallas
    grid_b = pl.cdiv(B, tm)

    # Scoped-VMEM limit: double-buffered x + out tiles (lane-padded to 128) + slack.
    lane_pad_bytes = tm * 128 * (x.dtype.itemsize + 4)
    vmem_limit = max(2 * lane_pad_bytes + (2 << 20), 8 << 20)

    cost = pl.CostEstimate(
        flops=2 * B * IN_FEATURES * OUT_FEATURES,
        transcendentals=0,
        bytes_accessed=(B * IN_FEATURES * x.dtype.itemsize
                        + B * OUT_FEATURES * 4
                        + IN_FEATURES * OUT_FEATURES * w.dtype.itemsize
                        + OUT_FEATURES * 4),
    )

    return pl.pallas_call(
        _linear_kernel,
        out_shape=jax.ShapeDtypeStruct((B, OUT_FEATURES), jnp.float32),
        grid=(grid_b,),
        in_specs=[
            pl.BlockSpec((tm, IN_FEATURES), lambda i: (i, 0)),         # batch-tiled x
            pl.BlockSpec((IN_FEATURES, OUT_FEATURES), lambda i: (0, 0)),  # resident W
            pl.BlockSpec((1, OUT_FEATURES), lambda i: (0, 0)),            # resident b
        ],
        out_specs=pl.BlockSpec((tm, OUT_FEATURES), lambda i: (i, 0)),   # direct (B, 9)
        compiler_params=pltpu.CompilerParams(
            dimension_semantics=("parallel",),   # shards batch across v7x TCs
            vmem_limit_bytes=int(vmem_limit),    # portable to v5e's 16 MiB default
        ),
        cost_estimate=cost,
    )(x, w, b_row)


if __name__ == "__main__":
    key = jax.random.PRNGKey(0)
    kx, kw, kb, kx2 = jax.random.split(key, 4)

    # Deterministic params (mimics nn.Linear uniform(-1/sqrt(in), 1/sqrt(in))).
    bound = 1.0 / jnp.sqrt(jnp.float32(IN_FEATURES))
    weight = jax.random.uniform(
        kw, (OUT_FEATURES, IN_FEATURES), jnp.float32, minval=-bound, maxval=bound)
    bias = jax.random.uniform(
        kb, (OUT_FEATURES,), jnp.float32, minval=-bound, maxval=bound)
    w_t, b_row = prepare_params(weight, bias)

    # Case 1: small batch, Pallas path forced (single full-extent tile).
    B = 8
    x = jax.random.normal(kx, (B, IN_FEATURES), dtype=jnp.float32)
    ref = x @ weight.T + bias
    out = jax.block_until_ready(
        symptom_classifier_forward(x, w_t, b_row, force_pallas=True))
    assert out.shape == (B, OUT_FEATURES)
    assert jnp.allclose(out, ref, atol=1e-4, rtol=1e-4)

    # Case 2: ragged multi-tile batch (>=2 grid steps + masked last block).
    B2 = 133
    x2 = jax.random.normal(kx2, (B2, IN_FEATURES), dtype=jnp.float32)
    ref2 = x2 @ weight.T + bias
    out2 = jax.block_until_ready(
        symptom_classifier_forward(x2, w_t, b_row, block_b=64, force_pallas=True))
    assert out2.shape == (B2, OUT_FEATURES)
    assert jnp.allclose(out2, ref2, atol=1e-4, rtol=1e-4)

    # Case 3: default dispatch — small-B XLA fallback path.
    out3 = jax.block_until_ready(symptom_classifier_forward(x, w_t, b_row))
    assert out3.shape == (B, OUT_FEATURES)
    assert jnp.allclose(out3, ref, atol=1e-5, rtol=1e-5)

    print("KERNEL_OK")
</pallas_src>

<mosaic_0001>
module attributes {stable_mosaic.version = 11 : i64} {
  func.func @_linear_kernel(%arg0: i32, %arg1: memref<8x38xf32, #tpu.memory_space<vmem>>, %arg2: memref<38x9xf32, #tpu.memory_space<vmem>>, %arg3: memref<1x9xf32, #tpu.memory_space<vmem>>, %arg4: memref<8x9xf32, #tpu.memory_space<vmem>>) attributes {dimension_semantics = [#tpu.dimension_semantics<parallel>], iteration_bounds = array<i64: 1>, scalar_prefetch = 0 : i64, scratch_operands = 0 : i64, tpu.core_type = #tpu.core_type<tc>, window_params = [{transform_indices = @transform_0, window_bounds = array<i64: 8, 38>}, {pipeline_mode = #tpu.pipeline_mode<synchronous>, transform_indices = @transform_1, window_bounds = array<i64: 38, 9>}, {pipeline_mode = #tpu.pipeline_mode<synchronous>, transform_indices = @transform_2, window_bounds = array<i64: 1, 9>}, {transform_indices = @transform_3, window_bounds = array<i64: 8, 9>}]} {
    %c0 = arith.constant 0 : index
    %c0_0 = arith.constant 0 : index
    %0 = vector.load %arg1[%c0, %c0_0] : memref<8x38xf32, #tpu.memory_space<vmem>>, vector<8x38xf32>
    %c0_1 = arith.constant 0 : index
    %c0_2 = arith.constant 0 : index
    %1 = vector.load %arg2[%c0_1, %c0_2] : memref<38x9xf32, #tpu.memory_space<vmem>>, vector<38x9xf32>
    %cst = arith.constant dense<0.000000e+00> : vector<8x9xf32>
    %2 = tpu.matmul %0, %1, %cst {dimension_numbers = #tpu.dot_dimension_numbers<[1], [0], [0], [1], [0, 0, 1, 1], [], []>} : vector<8x38xf32>, vector<38x9xf32>, vector<8x9xf32> -> vector<8x9xf32>
    %c0_3 = arith.constant 0 : index
    %c0_4 = arith.constant 0 : index
    %3 = vector.load %arg3[%c0_3, %c0_4] : memref<1x9xf32, #tpu.memory_space<vmem>>, vector<1x9xf32>
    %4 = vector.broadcast %3 : vector<1x9xf32> to vector<8x9xf32>
    %5 = arith.addf %2, %4 : vector<8x9xf32>
    %c0_5 = arith.constant 0 : index
    %c0_6 = arith.constant 0 : index
    %6 = vector.load %arg4[%c0_5, %c0_6] : memref<8x9xf32, #tpu.memory_space<vmem>>, vector<8x9xf32>
    tpu.vector_store %arg4[%c0_5, %c0_6], %5 {strides = array<i32>} : memref<8x9xf32, #tpu.memory_space<vmem>>, vector<8x9xf32>,
    return
  }
  func.func @transform_0(%arg0: i32) -> (i32, i32) {
    %c0_i32 = arith.constant 0 : i32
    %c0_i32_0 = arith.constant 0 : i32
    return %arg0, %c0_i32 : i32, i32
  }
  func.func @transform_1(%arg0: i32) -> (i32, i32) {
    %c0_i32 = arith.constant 0 : i32
    %c0_i32_0 = arith.constant 0 : i32
    %c0_i32_1 = arith.constant 0 : i32
    return %c0_i32, %c0_i32_0 : i32, i32
  }
  func.func @transform_2(%arg0: i32) -> (i32, i32) {
    %c0_i32 = arith.constant 0 : i32
    %c0_i32_0 = arith.constant 0 : i32
    %c0_i32_1 = arith.constant 0 : i32
    return %c0_i32, %c0_i32_0 : i32, i32
  }
  func.func @transform_3(%arg0: i32) -> (i32, i32) {
    %c0_i32 = arith.constant 0 : i32
    %c0_i32_0 = arith.constant 0 : i32
    return %arg0, %c0_i32 : i32, i32
  }
}

</mosaic_0001>

<bundles_post_ra>
// kernel: symptom_classifier_forward.1
= control target key start
LH: loop header
LB: loop body
LE: loop exit
PB: predicated region body
PF: predicated region fallthrough
CT: control target
= control target key end

     0   :  { %v178_v3 = vmov 0.0|0.0   ;;  %vm179_vm0 = vmmov 0   ;;  %v180_v6 = vmov 0.0   ;;  %s235_s0 = inlined_call_operand.vmem [shape: f32[8,38], index: 0, kind: input, shape index: {}]   ;;  %s236_s1 = inlined_call_operand.vmem [shape: f32[38,9], index: 1, kind: input, shape index: {}]   ;;  %s237_s2 = inlined_call_operand.vmem [shape: f32[1,9], index: 2, kind: input, shape index: {}]   ;;  %s238_s3 = inlined_call_operand.hbm [shape: f32[8,9], index: 3, kind: output, shape index: {}]  }
   0x1   :  { %v16_v0 = vld [vmem:[%s236_s1] sm:$0xff]  ;;  %v17_v1 = vld [vmem:[%s236_s1 + $0x8] sm:$0xff]  ;;  %v18_v2 = vld [vmem:[%s236_s1 + $0x10] sm:$0xff]  ;;  %144 = vmatprep.subr.bf16.mxu0 %v178_v3  ;;  %141 = vmatprep.mubr.msk.f32.mxu0 %vm179_vm0, %v180_v6 }
   0x2   :  { %v145_v4 = vpack.c.bf16 %v17_v1, %v16_v0  ;;  %v19_v5 = vld [vmem:[%s236_s1 + $0x18] sm:$0xff] }
   0x3   :  { %8 = vsyncpa [#allocation3], 0  ;;  %v148_v7 = vpack.c.bf16 %v19_v5, %v18_v2  ;;  %v20_v8 = vld [vmem:[%s236_s1 + $0x20] sm:$0x3f]  ;;  %vm32_vm1 = vcmask 1045504   ;;  %vm28_vm2 = vcmask 310272  }
   0x4   :  { %146 = vmatpush3.bf16.msra.mxu0 %v145_v4  ;;  %v15_v9 = vld [vmem:[%s235_s0] sm:$0xff]  ;;  %s181_s26 = smov [#allocation2]   ;;  %vm106_vm3 = vcmask 72704  }
   0x5   :  { %147 = vmatprep.subr.bf16.mxu0 %v178_v3  ;;  %v122_v10 = vld [vmem:[%s237_s2] ss:$0 sm:$0xff]  ;;  %s114_s27 = sshll.u32 %s181_s26, 4  ;;  %s115_s27 = int_to_ptr.vmem [resolvable:$true] %s114_s27 }
   0x6   :  { %s154_s1 = scalar_lea.vmem %s115_s27, 128  ;;  %p159_p1 = scmp.lt.s32.totalorder %s115_s27, %s115_s27 }
   0x7   :  { %p155_p0 = scmp.ne.s32.totalorder %s115_s27, %s154_s1  ;;  %p160_p2 = scmp.lt.s32.totalorder %s154_s1, %s154_s1 }
   0x8   :  { %149 = vmatpush3.bf16.msra.mxu0 %v148_v7 }
   0x9   :  { %139 = vmatprep.subr.mxu0 %v180_v6  ;;  %p161_p3 = por %p160_p2, %p159_p1 }
   0xb   :  { %p162_p4 = pnand %p161_p3, %p155_p0 }
   0xc   :  { %140 = vmatpush3.msk.msra.mxu0 %vm32_vm1, %v20_v8 }
   0xd   :  { %142 = vmatmul.mubr.msk.f32.vlgmr.msra.gmra.mrb[0].mxu0 %vm28_vm2, %v15_v9 }
  0xe0   :  { %v102_v11 = vpop.f32.mrb[0].mxu0 }
  0xe1   :  { %v103_v12 = vadd.f32 %v122_v10, %v102_v11  ;;  %v143_v13 = vpop.f32.mrb[1].mxu0 }
  0xe3   :  { %107 = vst.msk [vmem:[#allocation2] sm:$0xff] %vm106_vm3, %v103_v12 }
  0xe4   :  { %165 = shalt.err (!%p162_p4)
}
  0xe5   :  { %s166_s29 = scalar_lea.hbm %s238_s3, 128 }
  0xe6   :  { %p167_p5 = scmp.ne.s32.totalorder %s238_s3, %s166_s29  ;;  %p170_p6 = scmp.lt.u32.totalorder %s166_s29, %s238_s3 }
  0xe8   :  { %p172_p7 = pnand %p170_p6, %p167_p5 }
  0xea   :  { %175 = shalt.err (!%p172_p7)
}
  0xeb   :  { %117 = dma.vmem_to_hbm [thread:$0]  %s115_s27, 128, %s238_s3, [#allocation3]  }
  0xec   :  { %176 = dma.done.wait [#allocation3], 128  }
  0xed   :  { %177 = vsyncadd [#allocation3], 4294967168 }
  0xee   :  { %121 = vsyncpa [#allocation3], 1 }

</bundles_post_ra>
